<compile_context>
chip_gen: v7x
topology: tpu7x:2x2x1
jax: 0.10.0
libtpu: 0.0.40
codegen_flags: <defaults>
</compile_context>

<pallas_src>
import functools

import jax
import jax.numpy as jnp
from jax import lax
from jax.experimental import pallas as pl
from jax.experimental.pallas import tpu as pltpu


# ------------------------------ kernels --------------------------------------
def _relu(x):
    return jnp.maximum(x, 0.0)


def _bf16(x):
    return x.astype(jnp.bfloat16)


def _critic_train_kernel(s_ref, a_ref, tl_ref,
                         w1s_ref, w1a_ref, b1_ref,
                         w4z_ref, w4t_ref, b4_ref,
                         w5_ref, b5_ref,
                         q_ref):
    # encoder: Linear(obs+act -> 400) + ReLU, concat split into two matmuls.
    z = _relu(
        jnp.dot(_bf16(s_ref[...]), w1s_ref[...], preferred_element_type=jnp.float32)
        + jnp.dot(_bf16(a_ref[...]), w1a_ref[...], preferred_element_type=jnp.float32)
        + b1_ref[...])                                         # [TB, 400] f32

    # fc first layer: Linear(400+T -> 300) + ReLU (concat([z, t_labels]) split).
    g = _relu(
        jnp.dot(_bf16(z), w4z_ref[...], preferred_element_type=jnp.float32)
        + jnp.dot(_bf16(tl_ref[...]), w4t_ref[...], preferred_element_type=jnp.float32)
        + b4_ref[...])                                         # [TB, 300] f32

    # Linear(300 -> 1) as VPU mul + lane reduction (avoids an N=1 MXU matmul).
    q = jnp.sum(g * w5_ref[...], axis=-1, keepdims=True) + b5_ref[...]
    q_ref[...] = q.astype(q_ref.dtype)


def _critic_eval_kernel(s_ref, a_ref,
                        w1s_ref, w1a_ref, b1_ref,
                        w2_ref, b2_ref, w3_ref, b3_ref,
                        w4z_ref, w4t_ref, b4_ref,
                        w5_ref, b5_ref,
                        q_ref):
    z = _relu(
        jnp.dot(_bf16(s_ref[...]), w1s_ref[...], preferred_element_type=jnp.float32)
        + jnp.dot(_bf16(a_ref[...]), w1a_ref[...], preferred_element_type=jnp.float32)
        + b1_ref[...])                                         # [TB, 400] f32

    # logits_t: Linear(400 -> 64) + ReLU + Linear(64 -> T)  (used only in eval).
    h = _relu(jnp.dot(_bf16(z), w2_ref[...],
                      preferred_element_type=jnp.float32) + b2_ref[...])
    t_values = (jnp.dot(_bf16(h), w3_ref[...],
                        preferred_element_type=jnp.float32) + b3_ref[...])

    # t_p = one-hot(argmax(t_values, -1)); first index wins on ties,
    # matching torch.argmax + scatter.
    T = t_values.shape[-1]
    col = lax.broadcasted_iota(jnp.int32, t_values.shape, 1)
    max_v = jnp.max(t_values, axis=-1, keepdims=True)
    idx = jnp.min(jnp.where(t_values == max_v, col, T), axis=-1, keepdims=True)
    t_p = (col == idx).astype(jnp.bfloat16)                    # exact 0/1 one-hot

    g = _relu(
        jnp.dot(_bf16(z), w4z_ref[...], preferred_element_type=jnp.float32)
        + jnp.dot(t_p, w4t_ref[...], preferred_element_type=jnp.float32)
        + b4_ref[...])                                         # [TB, 300] f32

    q = jnp.sum(g * w5_ref[...], axis=-1, keepdims=True) + b5_ref[...]
    q_ref[...] = q.astype(q_ref.dtype)


# ------------------------------ wrapper ---------------------------------------
def _round_up(x, m):
    return ((x + m - 1) // m) * m


def prepare_kernel_params(params):
    """One-time host prep: bf16 MXU weights, f32 biases, f32 w5 as a row."""
    bf = lambda w: w.astype(jnp.bfloat16)
    return {
        "w1s": bf(params["w1s"]), "w1a": bf(params["w1a"]), "b1": params["b1"],
        "w2": bf(params["w2"]), "b2": params["b2"],
        "w3": bf(params["w3"]), "b3": params["b3"],
        "w4z": bf(params["w4z"]), "w4t": bf(params["w4t"]), "b4": params["b4"],
        "w5_row": params["w5"].reshape(1, -1),                 # (1, 300) f32
        "b5": params["b5"],
    }


@functools.partial(jax.jit, static_argnames=("training", "batch_tile"))
def encoder2_critic_forward(kparams, state, action, t_labels, *, training=True,
                            batch_tile=256):
    """Forward of encoder2_Critic. Returns (q, t_labels)."""
    B, obs = state.shape
    act = action.shape[1]
    T = kparams["w4t"].shape[0]

    # Batch tiling: TB is a multiple of 8 (f32 sublanes); pad B up to Bp.
    TB = min(batch_tile, _round_up(B, 8))
    Bp = _round_up(B, TB)
    t_labels_k = t_labels
    if Bp != B:
        pad = ((0, Bp - B), (0, 0))
        state = jnp.pad(state, pad)
        action = jnp.pad(action, pad)
        if training:
            t_labels_k = jnp.pad(t_labels, pad)
    grid = (Bp // TB,)

    def tiled(feat):    # batch-tiled activations
        return pl.BlockSpec((TB, feat), lambda i: (i, 0))

    def resident(arr):  # weights/biases stay VMEM-resident across grid steps
        return pl.BlockSpec(arr.shape, lambda i: (0, 0))

    p = kparams
    if training:
        kernel = _critic_train_kernel
        operands = (state, action, t_labels_k,
                    p["w1s"], p["w1a"], p["b1"],
                    p["w4z"], p["w4t"], p["b4"], p["w5_row"], p["b5"])
        in_specs = [tiled(obs), tiled(act), tiled(T),
                    resident(p["w1s"]), resident(p["w1a"]), resident(p["b1"]),
                    resident(p["w4z"]), resident(p["w4t"]), resident(p["b4"]),
                    resident(p["w5_row"]), resident(p["b5"])]
        flops = 2 * Bp * (obs * 400 + act * 400 + 400 * 300 + T * 300 + 300)
    else:
        kernel = _critic_eval_kernel
        operands = (state, action,
                    p["w1s"], p["w1a"], p["b1"],
                    p["w2"], p["b2"], p["w3"], p["b3"],
                    p["w4z"], p["w4t"], p["b4"], p["w5_row"], p["b5"])
        in_specs = [tiled(obs), tiled(act),
                    resident(p["w1s"]), resident(p["w1a"]), resident(p["b1"]),
                    resident(p["w2"]), resident(p["b2"]),
                    resident(p["w3"]), resident(p["b3"]),
                    resident(p["w4z"]), resident(p["w4t"]), resident(p["b4"]),
                    resident(p["w5_row"]), resident(p["b5"])]
        flops = 2 * Bp * (obs * 400 + act * 400 + 400 * 64 + 64 * T
                          + 400 * 300 + T * 300 + 300)

    bytes_accessed = int(sum(int(o.size) * o.dtype.itemsize for o in operands)
                         + Bp * 4)

    q = pl.pallas_call(
        kernel,
        out_shape=jax.ShapeDtypeStruct((Bp, 1), jnp.float32),
        grid=grid,
        in_specs=in_specs,
        out_specs=pl.BlockSpec((TB, 1), lambda i: (i, 0)),
        compiler_params=pltpu.CompilerParams(
            dimension_semantics=("parallel",)),
        cost_estimate=pl.CostEstimate(
            flops=flops, transcendentals=0, bytes_accessed=bytes_accessed),
    )(*operands)

    return q[:B], t_labels


# --------------------------- parameter init -----------------------------------
def init_params(key, obs_dims, act_dims, num_treatment):
    """f32 master params. Linear weights stored transposed ([in, out]); w1 / w4
    are pre-split to match the kernel's concat-free matmuls."""
    specs = {
        "w1": ((obs_dims + act_dims, 400), obs_dims + act_dims),
        "b1": ((1, 400), obs_dims + act_dims),
        "w2": ((400, 64), 400),
        "b2": ((1, 64), 400),
        "w3": ((64, num_treatment), 64),
        "b3": ((1, num_treatment), 64),
        "w4": ((400 + num_treatment, 300), 400 + num_treatment),
        "b4": ((1, 300), 400 + num_treatment),
        "w5": ((300, 1), 300),
        "b5": ((1, 1), 300),
    }
    raw = {}
    for name, (shape, fan_in) in specs.items():
        key, sub = jax.random.split(key)
        bound = 1.0 / float(fan_in) ** 0.5
        raw[name] = jax.random.uniform(sub, shape, jnp.float32, -bound, bound)
    params = dict(raw)
    params["w1s"] = raw["w1"][:obs_dims]
    params["w1a"] = raw["w1"][obs_dims:]
    params["w4z"] = raw["w4"][:400]
    params["w4t"] = raw["w4"][400:]
    del params["w1"], params["w4"]
    return params


# ------------------------- pure-JAX reference ---------------------------------
def _reference(params, state, action, t_labels, training=True):
    xa = jnp.concatenate([state, action], axis=1)
    w1 = jnp.concatenate([params["w1s"], params["w1a"]], axis=0)
    z = jax.nn.relu(xa @ w1 + params["b1"])
    h = jax.nn.relu(z @ params["w2"] + params["b2"])
    t_values = h @ params["w3"] + params["b3"]
    t_p = jax.nn.one_hot(jnp.argmax(t_values, axis=-1), t_values.shape[-1],
                         dtype=jnp.float32)
    t_sel = t_labels if training else t_p
    zt = jnp.concatenate([z, t_sel], axis=-1)
    w4 = jnp.concatenate([params["w4z"], params["w4t"]], axis=0)
    g = jax.nn.relu(zt @ w4 + params["b4"])
    return g @ params["w5"] + params["b5"]


# --------------------------------- demo ----------------------------------------
if __name__ == "__main__":
    B, OBS, ACT, T = 8, 16, 4, 4

    key = jax.random.PRNGKey(0)
    k_p, k_s, k_a, k_t = jax.random.split(key, 4)

    params = init_params(k_p, OBS, ACT, T)
    kparams = prepare_kernel_params(params)
    state = jax.random.normal(k_s, (B, OBS), dtype=jnp.float32)
    action = jax.random.normal(k_a, (B, ACT), dtype=jnp.float32)
    t_idx = jax.random.randint(k_t, (B,), 0, T)
    t_labels = jax.nn.one_hot(t_idx, T, dtype=jnp.float32)

    # training mode (uses t_labels; logits branch statically skipped)
    q_tr, t_out = encoder2_critic_forward(kparams, state, action, t_labels,
                                          training=True)
    # eval mode (argmax one-hot path; t_labels not DMA'd into the kernel)
    q_ev, _ = encoder2_critic_forward(kparams, state, action, t_labels,
                                      training=False)
    jax.block_until_ready((q_tr, q_ev, t_out))

    assert q_tr.shape == (B, 1) and q_ev.shape == (B, 1)
    assert t_out.shape == (B, T)

    # loose tolerance: bf16 matmul operands vs f32 reference
    q_ref_tr = _reference(params, state, action, t_labels, training=True)
    q_ref_ev = _reference(params, state, action, t_labels, training=False)
    assert jnp.allclose(q_tr, q_ref_tr, rtol=1e-1, atol=2e-2)
    assert jnp.allclose(q_ev, q_ref_ev, rtol=1e-1, atol=2e-2)

    print("KERNEL_OK")
</pallas_src>

<mosaic_0001>
module attributes {stable_mosaic.version = 11 : i64} {
  func.func @_critic_train_kernel(%arg0: i32, %arg1: memref<8x16xf32, #tpu.memory_space<vmem>>, %arg2: memref<8x4xf32, #tpu.memory_space<vmem>>, %arg3: memref<8x4xf32, #tpu.memory_space<vmem>>, %arg4: memref<16x400xbf16, #tpu.memory_space<vmem>>, %arg5: memref<4x400xbf16, #tpu.memory_space<vmem>>, %arg6: memref<1x400xf32, #tpu.memory_space<vmem>>, %arg7: memref<400x300xbf16, #tpu.memory_space<vmem>>, %arg8: memref<4x300xbf16, #tpu.memory_space<vmem>>, %arg9: memref<1x300xf32, #tpu.memory_space<vmem>>, %arg10: memref<1x300xf32, #tpu.memory_space<vmem>>, %arg11: memref<1x1xf32, #tpu.memory_space<vmem>>, %arg12: memref<8x1xf32, #tpu.memory_space<vmem>>) attributes {dimension_semantics = [#tpu.dimension_semantics<parallel>], iteration_bounds = array<i64: 1>, scalar_prefetch = 0 : i64, scratch_operands = 0 : i64, tpu.core_type = #tpu.core_type<tc>, window_params = [{transform_indices = @transform_0, window_bounds = array<i64: 8, 16>}, {transform_indices = @transform_1, window_bounds = array<i64: 8, 4>}, {transform_indices = @transform_2, window_bounds = array<i64: 8, 4>}, {pipeline_mode = #tpu.pipeline_mode<synchronous>, transform_indices = @transform_3, window_bounds = array<i64: 16, 400>}, {pipeline_mode = #tpu.pipeline_mode<synchronous>, transform_indices = @transform_4, window_bounds = array<i64: 4, 400>}, {pipeline_mode = #tpu.pipeline_mode<synchronous>, transform_indices = @transform_5, window_bounds = array<i64: 1, 400>}, {pipeline_mode = #tpu.pipeline_mode<synchronous>, transform_indices = @transform_6, window_bounds = array<i64: 400, 300>}, {pipeline_mode = #tpu.pipeline_mode<synchronous>, transform_indices = @transform_7, window_bounds = array<i64: 4, 300>}, {pipeline_mode = #tpu.pipeline_mode<synchronous>, transform_indices = @transform_8, window_bounds = array<i64: 1, 300>}, {pipeline_mode = #tpu.pipeline_mode<synchronous>, transform_indices = @transform_9, window_bounds = array<i64: 1, 300>}, {pipeline_mode = #tpu.pipeline_mode<synchronous>, transform_indices = @transform_10, window_bounds = array<i64: 1, 1>}, {transform_indices = @transform_11, window_bounds = array<i64: 8, 1>}]} {
    %c0 = arith.constant 0 : index
    %c0_0 = arith.constant 0 : index
    %0 = vector.load %arg1[%c0, %c0_0] : memref<8x16xf32, #tpu.memory_space<vmem>>, vector<8x16xf32>
    %1 = arith.truncf %0 : vector<8x16xf32> to vector<8x16xbf16>
    %c0_1 = arith.constant 0 : index
    %c0_2 = arith.constant 0 : index
    %2 = vector.load %arg4[%c0_1, %c0_2] : memref<16x400xbf16, #tpu.memory_space<vmem>>, vector<16x400xbf16>
    %cst = arith.constant dense<0.000000e+00> : vector<8x400xf32>
    %3 = tpu.matmul %1, %2, %cst {dimension_numbers = #tpu.dot_dimension_numbers<[1], [0], [0], [1], [0, 0, 1, 1], [], []>} : vector<8x16xbf16>, vector<16x400xbf16>, vector<8x400xf32> -> vector<8x400xf32>
    %c0_3 = arith.constant 0 : index
    %c0_4 = arith.constant 0 : index
    %4 = vector.load %arg2[%c0_3, %c0_4] : memref<8x4xf32, #tpu.memory_space<vmem>>, vector<8x4xf32>
    %5 = arith.truncf %4 : vector<8x4xf32> to vector<8x4xbf16>
    %c0_5 = arith.constant 0 : index
    %c0_6 = arith.constant 0 : index
    %6 = vector.load %arg5[%c0_5, %c0_6] : memref<4x400xbf16, #tpu.memory_space<vmem>>, vector<4x400xbf16>
    %cst_7 = arith.constant dense<0.000000e+00> : vector<8x400xf32>
    %7 = tpu.matmul %5, %6, %cst_7 {dimension_numbers = #tpu.dot_dimension_numbers<[1], [0], [0], [1], [0, 0, 1, 1], [], []>} : vector<8x4xbf16>, vector<4x400xbf16>, vector<8x400xf32> -> vector<8x400xf32>
    %8 = arith.addf %3, %7 : vector<8x400xf32>
    %c0_8 = arith.constant 0 : index
    %c0_9 = arith.constant 0 : index
    %9 = vector.load %arg6[%c0_8, %c0_9] : memref<1x400xf32, #tpu.memory_space<vmem>>, vector<1x400xf32>
    %10 = vector.broadcast %9 : vector<1x400xf32> to vector<8x400xf32>
    %11 = arith.addf %8, %10 : vector<8x400xf32>
    %cst_10 = arith.constant 0.000000e+00 : f32
    %12 = vector.broadcast %cst_10 : f32 to vector<8x400xf32>
    %13 = arith.maximumf %11, %12 : vector<8x400xf32>
    %14 = arith.truncf %13 : vector<8x400xf32> to vector<8x400xbf16>
    %c0_11 = arith.constant 0 : index
    %c0_12 = arith.constant 0 : index
    %15 = vector.load %arg7[%c0_11, %c0_12] : memref<400x300xbf16, #tpu.memory_space<vmem>>, vector<400x300xbf16>
    %cst_13 = arith.constant dense<0.000000e+00> : vector<8x300xf32>
    %16 = tpu.matmul %14, %15, %cst_13 {dimension_numbers = #tpu.dot_dimension_numbers<[1], [0], [0], [1], [0, 0, 1, 1], [], []>} : vector<8x400xbf16>, vector<400x300xbf16>, vector<8x300xf32> -> vector<8x300xf32>
    %c0_14 = arith.constant 0 : index
    %c0_15 = arith.constant 0 : index
    %17 = vector.load %arg3[%c0_14, %c0_15] : memref<8x4xf32, #tpu.memory_space<vmem>>, vector<8x4xf32>
    %18 = arith.truncf %17 : vector<8x4xf32> to vector<8x4xbf16>
    %c0_16 = arith.constant 0 : index
    %c0_17 = arith.constant 0 : index
    %19 = vector.load %arg8[%c0_16, %c0_17] : memref<4x300xbf16, #tpu.memory_space<vmem>>, vector<4x300xbf16>
    %cst_18 = arith.constant dense<0.000000e+00> : vector<8x300xf32>
    %20 = tpu.matmul %18, %19, %cst_18 {dimension_numbers = #tpu.dot_dimension_numbers<[1], [0], [0], [1], [0, 0, 1, 1], [], []>} : vector<8x4xbf16>, vector<4x300xbf16>, vector<8x300xf32> -> vector<8x300xf32>
    %21 = arith.addf %16, %20 : vector<8x300xf32>
    %c0_19 = arith.constant 0 : index
    %c0_20 = arith.constant 0 : index
    %22 = vector.load %arg9[%c0_19, %c0_20] : memref<1x300xf32, #tpu.memory_space<vmem>>, vector<1x300xf32>
    %23 = vector.broadcast %22 : vector<1x300xf32> to vector<8x300xf32>
    %24 = arith.addf %21, %23 : vector<8x300xf32>
    %cst_21 = arith.constant 0.000000e+00 : f32
    %25 = vector.broadcast %cst_21 : f32 to vector<8x300xf32>
    %26 = arith.maximumf %24, %25 : vector<8x300xf32>
    %c0_22 = arith.constant 0 : index
    %c0_23 = arith.constant 0 : index
    %27 = vector.load %arg10[%c0_22, %c0_23] : memref<1x300xf32, #tpu.memory_space<vmem>>, vector<1x300xf32>
    %28 = vector.broadcast %27 : vector<1x300xf32> to vector<8x300xf32>
    %29 = arith.mulf %26, %28 : vector<8x300xf32>
    %cst_24 = arith.constant dense<0.000000e+00> : vector<8xf32>
    %30 = vector.multi_reduction <add>, %29, %cst_24 [1] : vector<8x300xf32> to vector<8xf32>
    %31 = vector.shape_cast %30 : vector<8xf32> to vector<8x1xf32>
    %c0_25 = arith.constant 0 : index
    %c0_26 = arith.constant 0 : index
    %32 = vector.load %arg11[%c0_25, %c0_26] : memref<1x1xf32, #tpu.memory_space<vmem>>, vector<1x1xf32>
    %33 = vector.broadcast %32 : vector<1x1xf32> to vector<8x1xf32>
    %34 = arith.addf %31, %33 : vector<8x1xf32>
    %c0_27 = arith.constant 0 : index
    %c0_28 = arith.constant 0 : index
    %35 = vector.load %arg12[%c0_27, %c0_28] : memref<8x1xf32, #tpu.memory_space<vmem>>, vector<8x1xf32>
    tpu.vector_store %arg12[%c0_27, %c0_28], %34 {strides = array<i32>} : memref<8x1xf32, #tpu.memory_space<vmem>>, vector<8x1xf32>,
    return
  }
  func.func @transform_0(%arg0: i32) -> (i32, i32) {
    %c0_i32 = arith.constant 0 : i32
    %c0_i32_0 = arith.constant 0 : i32
    return %arg0, %c0_i32 : i32, i32
  }
  func.func @transform_1(%arg0: i32) -> (i32, i32) {
    %c0_i32 = arith.constant 0 : i32
    %c0_i32_0 = arith.constant 0 : i32
    return %arg0, %c0_i32 : i32, i32
  }
  func.func @transform_2(%arg0: i32) -> (i32, i32) {
    %c0_i32 = arith.constant 0 : i32
    %c0_i32_0 = arith.constant 0 : i32
    return %arg0, %c0_i32 : i32, i32
  }
  func.func @transform_3(%arg0: i32) -> (i32, i32) {
    %c0_i32 = arith.constant 0 : i32
    %c0_i32_0 = arith.constant 0 : i32
    %c0_i32_1 = arith.constant 0 : i32
    return %c0_i32, %c0_i32_0 : i32, i32
  }
  func.func @transform_4(%arg0: i32) -> (i32, i32) {
    %c0_i32 = arith.constant 0 : i32
    %c0_i32_0 = arith.constant 0 : i32
    %c0_i32_1 = arith.constant 0 : i32
    return %c0_i32, %c0_i32_0 : i32, i32
  }
  func.func @transform_5(%arg0: i32) -> (i32, i32) {
    %c0_i32 = arith.constant 0 : i32
    %c0_i32_0 = arith.constant 0 : i32
    %c0_i32_1 = arith.constant 0 : i32
    return %c0_i32, %c0_i32_0 : i32, i32
  }
  func.func @transform_6(%arg0: i32) -> (i32, i32) {
    %c0_i32 = arith.constant 0 : i32
    %c0_i32_0 = arith.constant 0 : i32
    %c0_i32_1 = arith.constant 0 : i32
    return %c0_i32, %c0_i32_0 : i32, i32
  }
  func.func @transform_7(%arg0: i32) -> (i32, i32) {
    %c0_i32 = arith.constant 0 : i32
    %c0_i32_0 = arith.constant 0 : i32
    %c0_i32_1 = arith.constant 0 : i32
    return %c0_i32, %c0_i32_0 : i32, i32
  }
  func.func @transform_8(%arg0: i32) -> (i32, i32) {
    %c0_i32 = arith.constant 0 : i32
    %c0_i32_0 = arith.constant 0 : i32
    %c0_i32_1 = arith.constant 0 : i32
    return %c0_i32, %c0_i32_0 : i32, i32
  }
  func.func @transform_9(%arg0: i32) -> (i32, i32) {
    %c0_i32 = arith.constant 0 : i32
    %c0_i32_0 = arith.constant 0 : i32
    %c0_i32_1 = arith.constant 0 : i32
    return %c0_i32, %c0_i32_0 : i32, i32
  }
  func.func @transform_10(%arg0: i32) -> (i32, i32) {
    %c0_i32 = arith.constant 0 : i32
    %c0_i32_0 = arith.constant 0 : i32
    %c0_i32_1 = arith.constant 0 : i32
    return %c0_i32, %c0_i32_0 : i32, i32
  }
  func.func @transform_11(%arg0: i32) -> (i32, i32) {
    %c0_i32 = arith.constant 0 : i32
    %c0_i32_0 = arith.constant 0 : i32
    return %arg0, %c0_i32 : i32, i32
  }
}

</mosaic_0001>

<bundles_post_ra>
// kernel: encoder2_critic_forward.1
= control target key start
LH: loop header
LB: loop body
LE: loop exit
PB: predicated region body
PF: predicated region fallthrough
CT: control target
= control target key end

     0   :  { %s1792_s0 = inlined_call_operand.vmem [shape: f32[8,16], index: 0, kind: input, shape index: {}]   ;;  %s1793_s1 = inlined_call_operand.vmem [shape: f32[8,4], index: 1, kind: input, shape index: {}]   ;;  %s1794_s2 = inlined_call_operand.vmem [shape: f32[8,4], index: 2, kind: input, shape index: {}]   ;;  %s1795_s3 = inlined_call_operand.vmem [shape: bf16[16,400], index: 3, kind: input, shape index: {}]   ;;  %s1796_s4 = inlined_call_operand.hbm [shape: bf16[4,400], index: 4, kind: input, shape index: {}]   ;;  %s1797_s5 = inlined_call_operand.vmem [shape: f32[1,400], index: 5, kind: input, shape index: {}]   ;;  %s1798_s6 = inlined_call_operand.hbm [shape: bf16[400,300], index: 6, kind: input, shape index: {}]   ;;  %s1799_s7 = inlined_call_operand.hbm [shape: bf16[4,300], index: 7, kind: input, shape index: {}]   ;;  %s1800_s8 = inlined_call_operand.hbm [shape: f32[1,300], index: 8, kind: input, shape index: {}]   ;;  %s1801_s9 = inlined_call_operand.hbm [shape: f32[1,300], index: 9, kind: input, shape index: {}]   ;;  %s1802_s10 = inlined_call_operand.<no memory space> [shape: f32[1,1], index: 10, kind: input, shape index: {}]   ;;  %s1803_s11 = inlined_call_operand.vmem [shape: f32[8,1], index: 11, kind: output, shape index: {}]  }
   0x1   :  { %v16_v0 = vstv %s1802_s10 }
   0x2   :  { %17 = vst [vmem:[#allocation2] sm:$0x1] %v16_v0 }
   0x3   :  { %18 = vsyncpa [#allocation4], 0 }
   0x4   :  { %19 = vsyncpa [#allocation6], 0 }
   0x5   :  { %20 = vsyncpa [#allocation9], 0  ;;  %s1567_s19 = smov [#allocation5]   ;;  %s1451_s23 = scalar_lea.hbm %s1798_s6, 9600 }
   0x6   :  { %s46_s20 = sshll.u32 %s1567_s19, 4  ;;  %p1452_p0 = scmp.ne.s32.totalorder %s1798_s6, %s1451_s23  ;;  %s47_s20 = int_to_ptr.vmem [resolvable:$true] %s46_s20 }
   0x7   :  { %p1455_p1 = scmp.lt.u32.totalorder %s1451_s23, %s1798_s6 }
   0x9   :  { %p1457_p2 = pnand %p1455_p1, %p1452_p0 }
   0xb   :  { %1460 = shalt.err (!%p1457_p2)
}
   0xc   :  { %s1461_s10 = scalar_lea.vmem %s47_s20, 9600  ;;  %p1466_p4 = scmp.lt.s32.totalorder %s47_s20, %s47_s20 }
   0xd   :  { %p1462_p3 = scmp.ne.s32.totalorder %s47_s20, %s1461_s10  ;;  %p1467_p5 = scmp.lt.s32.totalorder %s1461_s10, %s1461_s10 }
   0xf   :  { %p1468_p6 = por %p1467_p5, %p1466_p4 }
  0x11   :  { %p1469_p7 = pnand %p1468_p6, %p1462_p3 }
  0x13   :  { %1472 = shalt.err (!%p1469_p7)
}
  0x14   :  { %s1568_s28 = smov 192   ;;  %s1569_s29 = smov 12  }
  0x15   :  { %52 = dma.hbm_to_vmem [thread:$0]  %s1798_s6, 9600, %s47_s20, [#allocation6], %s1568_s28, %s1568_s28, %s1569_s29  }
  0x16   :  { %s1570_s13 = smov [#allocation8]   ;;  %s1571_s15 = smov [#allocation3]  }
  0x17   :  { %s69_s14 = sshll.u32 %s1570_s13, 4  ;;  %s35_s16 = sshll.u32 %s1571_s15, 4  ;;  %s70_s14 = int_to_ptr.vmem [resolvable:$true] %s69_s14  ;;  %s36_s16 = int_to_ptr.vmem [resolvable:$true] %s35_s16 }
  0x18   :  { %s1473_s19 = scalar_lea.hbm %s1800_s8, 48 }
  0x19   :  { %p1474_p8 = scmp.ne.s32.totalorder %s1800_s8, %s1473_s19  ;;  %p1477_p9 = scmp.lt.u32.totalorder %s1473_s19, %s1800_s8 }
  0x1b   :  { %p1479_p10 = pnand %p1477_p9, %p1474_p8 }
  0x1d   :  { %1482 = shalt.err (!%p1479_p10)
}
  0x1e   :  { %s1483_s6 = scalar_lea.vmem %s70_s14, 48  ;;  %s1487_s20 = scalar_lea.vmem %s70_s14, 64 }
  0x1f   :  { %p1484_p11 = scmp.ne.s32.totalorder %s70_s14, %s1483_s6  ;;  %p1488_p12 = scmp.lt.s32.totalorder %s70_s14, %s70_s14 }
  0x20   :  { %p1489_p13 = scmp.lt.s32.totalorder %s1487_s20, %s1483_s6 }
  0x22   :  { %p1490_p0 = por %p1489_p13, %p1488_p12 }
  0x24   :  { %p1491_p1 = pnand %p1490_p0, %p1484_p11 }
  0x26   :  { %1494 = shalt.err (!%p1491_p1)
}
  0x27   :  { %72 = dma.hbm_to_vmem [thread:$0]  %s1800_s8, 48, %s70_s14, [#allocation9]  }
  0x28   :  { %s1495_s28 = scalar_lea.hbm %s1796_s4, 128 }
  0x29   :  { %p1496_p2 = scmp.ne.s32.totalorder %s1796_s4, %s1495_s28  ;;  %p1499_p3 = scmp.lt.u32.totalorder %s1495_s28, %s1796_s4 }
  0x2b   :  { %p1501_p4 = pnand %p1499_p3, %p1496_p2 }
  0x2d   :  { %1504 = shalt.err (!%p1501_p4)
}
  0x2e   :  { %s1505_s15 = scalar_lea.vmem %s36_s16, 128  ;;  %p1510_p6 = scmp.lt.s32.totalorder %s36_s16, %s36_s16 }
  0x2f   :  { %p1506_p5 = scmp.ne.s32.totalorder %s36_s16, %s1505_s15  ;;  %p1511_p7 = scmp.lt.s32.totalorder %s1505_s15, %s1505_s15 }
  0x31   :  { %p1512_p8 = por %p1511_p7, %p1510_p6 }
  0x33   :  { %p1513_p9 = pnand %p1512_p8, %p1506_p5 }
  0x35   :  { %1516 = shalt.err (!%p1513_p9)
}
  0x36   :  { %38 = dma.hbm_to_vmem [thread:$0]  %s1796_s4, 128, %s36_s16, [#allocation4]  }
  0x37   :  { %s1572_s17 = smov [#allocation7]   ;;  %s1573_s19 = smov [#allocation10]  }
  0x38   :  { %s59_s18 = sshll.u32 %s1572_s17, 4  ;;  %s79_s21 = sshll.u32 %s1573_s19, 4  ;;  %s60_s18 = int_to_ptr.vmem [resolvable:$true] %s59_s18  ;;  %s80_s21 = int_to_ptr.vmem [resolvable:$true] %s79_s21 }
  0x39   :  { %s1517_s24 = scalar_lea.hbm %s1799_s7, 96 }
  0x3a   :  { %p1518_p10 = scmp.ne.s32.totalorder %s1799_s7, %s1517_s24  ;;  %p1521_p11 = scmp.lt.u32.totalorder %s1517_s24, %s1799_s7 }
  0x3c   :  { %p1523_p12 = pnand %p1521_p11, %p1518_p10 }
  0x3e   :  { %1526 = shalt.err (!%p1523_p12)
}
  0x3f   :  { %s1527_s4 = scalar_lea.vmem %s60_s18, 96  ;;  %p1532_p0 = scmp.lt.s32.totalorder %s60_s18, %s60_s18 }
  0x40   :  { %p1528_p13 = scmp.ne.s32.totalorder %s60_s18, %s1527_s4  ;;  %p1533_p1 = scmp.lt.s32.totalorder %s1527_s4, %s1527_s4 }
  0x42   :  { %p1534_p2 = por %p1533_p1, %p1532_p0 }
  0x44   :  { %p1535_p3 = pnand %p1534_p2, %p1528_p13 }
  0x46   :  { %1538 = shalt.err (!%p1535_p3)
}
  0x47   :  { %62 = dma.hbm_to_vmem [thread:$0]  %s1799_s7, 96, %s60_s18, [#allocation6]  }
  0x48   :  { %s1539_s29 = scalar_lea.hbm %s1801_s9, 48 }
  0x49   :  { %p1540_p4 = scmp.ne.s32.totalorder %s1801_s9, %s1539_s29  ;;  %p1543_p5 = scmp.lt.u32.totalorder %s1539_s29, %s1801_s9 }
  0x4b   :  { %p1545_p6 = pnand %p1543_p5, %p1540_p4 }
  0x4d   :  { %1548 = shalt.err (!%p1545_p6)
}
  0x4e   :  { %s1549_s8 = scalar_lea.vmem %s80_s21, 48  ;;  %s1553_s14 = scalar_lea.vmem %s80_s21, 64 }
  0x4f   :  { %p1550_p7 = scmp.ne.s32.totalorder %s80_s21, %s1549_s8  ;;  %p1554_p8 = scmp.lt.s32.totalorder %s80_s21, %s80_s21 }
  0x50   :  { %p1555_p9 = scmp.lt.s32.totalorder %s1553_s14, %s1549_s8 }
  0x52   :  { %p1556_p10 = por %p1555_p9, %p1554_p8 }
  0x54   :  { %p1557_p11 = pnand %p1556_p10, %p1550_p7 }
  0x56   :  { %1560 = shalt.err (!%p1557_p11)
}
  0x57   :  { %82 = dma.hbm_to_vmem [thread:$0]  %s1801_s9, 48, %s80_s21, [#allocation9]  }
  0x58   :  { %1561 = dma.done.wait [#allocation4], 128  }
  0x59   :  { %1562 = vsyncadd [#allocation4], 4294967168 }
  0x5a   :  { %1563 = dma.done.wait [#allocation6], 9696  }
  0x5b   :  { %1564 = vsyncadd [#allocation6], 4294957600 }
  0x5c   :  { %1565 = dma.done.wait [#allocation9], 96  }
  0x5d   :  { %1566 = vsyncadd [#allocation9], 4294967200  ;;  %v115_v1 = vlaneseq  ;;  %v1574_v2 = vmov 1983009808   ;;  %v1575_v4 = vmov 0   ;;  %v109_v8 = vld [vmem:[#allocation3] sm:$0xff] }
  0x5e   :  { %v113_v3 = vunpack.c.l.s4 %v1574_v2  ;;  %177 = vmatprep.mubr.bf16.mxu1 %v1575_v4  ;;  %531 = vmatprep.mubr.bf16.mxu0 %v1575_v4  ;;  %vm132_vm0 = vcmask 1041408   ;;  %v111_v9 = vcombine.high %v109_v8, %v109_v8  ;;  %v107_v11 = vld [vmem:[%s1793_s1] sm:$0xff]  ;;  %vm128_vm1 = vcmask 31744   ;;  %v1353_v24 = vld [vmem:[#allocation5 + $0x4] ss:$12 sps:$4 sm:$0xff]  }
  0x5f   :  { %v1703_v5 = vshrl.u32 %v115_v1, 7  ;;  %v469_v15 = vld [vmem:[#allocation7] sm:$0x3f]  ;;  %v108_v16 = vpack.c.bf16 %v107_v11, %v107_v11  ;;  %v1351_v26 = vld [vmem:[#allocation5] ss:$12 sps:$4 sm:$0xff]   ;;  %vm247_vm2 = vcmask 130048  }
  0x60   :  { %v114_v6 = vunpack.c.0.s8 %v113_v3  ;;  %v1346_v19 = vld [vmem:[%s1795_s3 + $0x4] ss:$16 sps:$4 sm:$0xff]   ;;  %v1344_v28 = vld [vmem:[%s1795_s3] ss:$16 sps:$4 sm:$0xff]   ;;  %v1349_v29 = vld [vmem:[%s1795_s3 + $0xc] ss:$16 sps:$4 sm:$0xff]   ;;  %v471_v36 = vcombine.high %v469_v15, %v469_v15 }
  0x61   :  { %v467_v22 = vld [vmem:[%s1794_s2] sm:$0xff]  ;;  %v1347_v35 = vld [vmem:[%s1795_s3 + $0x8] ss:$16 sps:$4 sm:$0xff]   ;;  %v1576_v43 = vmov 0.0   ;;  %vm1577_vm3 = vmmov 0   ;;  %vm1189_vm4 = vcmask 359424  }
  0x62   :  { %v117_v7 = vsub.s32 %v114_v6, %v1703_v5  ;;  %v468_v25 = vpack.c.bf16 %v467_v22, %v467_v22  ;;  %v1356_v27 = vld [vmem:[#allocation5 + $0x1c] ss:$12 sps:$4 sm:$0xff]   ;;  %v1354_v30 = vld [vmem:[#allocation5 + $0x18] ss:$12 sps:$4 sm:$0xff]   ;;  %v1359_v31 = vld [vmem:[#allocation5 + $0x34] ss:$12 sps:$4 sm:$0xff]  }
  0x63   :  { %v101_v32 = vld [vmem:[%s1792_s0] sm:$0xff]  ;;  %v1365_v39 = vld [vmem:[#allocation5 + $0x64] ss:$12 sps:$4 sm:$0xff]   ;;  %v1363_v41 = vld [vmem:[#allocation5 + $0x60] ss:$12 sps:$4 sm:$0xff]   ;;  %vm1202_vm5 = vcmask 7168  }
  0x64   :  { %v118_v10 = vrot.slane %v109_v8, %v117_v7  ;;  %v125_v12 = vrot.slane %v111_v9, %v117_v7  ;;  %v478_v18 = vrot.slane %v469_v15, %v117_v7  ;;  %v1357_v33 = vld [vmem:[#allocation5 + $0x30] ss:$12 sps:$4 sm:$0xff]   ;;  %v1362_v34 = vld [vmem:[#allocation5 + $0x4c] ss:$12 sps:$4 sm:$0xff]   ;;  %v102_v37 = vpack.c.bf16 %v101_v32, %v101_v32  ;;  %v1360_v38 = vld [vmem:[#allocation5 + $0x48] ss:$12 sps:$4 sm:$0xff]  }
  0x65   :  { %v485_v40 = vrot.slane %v471_v36, %v117_v7  ;;  %v1368_v42 = vld [vmem:[#allocation5 + $0x7c] ss:$12 sps:$4 sm:$0xff]   ;;  %v1366_v45 = vld [vmem:[#allocation5 + $0x78] ss:$12 sps:$4 sm:$0xff]   ;;  %v1371_v47 = vld [vmem:[#allocation5 + $0x94] ss:$12 sps:$4 sm:$0xff]  }
  0x66   :  { %v126_v13 = vcombine.high %v118_v10, %v118_v10  ;;  %v134_v14 = vsel %vm132_vm0, %v118_v10, 0  ;;  %v127_v17 = vcombine.high %v125_v12, %v125_v12  ;;  %v140_v20 = vsel %vm132_vm0, %v125_v12, 0  ;;  %v1383_v46 = vld [vmem:[#allocation5 + $0x184] ss:$12 sps:$4 sm:$0xff]   ;;  %v1374_v49 = vld [vmem:[#allocation5 + $0xac] ss:$12 sps:$4 sm:$0xff]  }
  0x67   :  { %v486_v21 = vcombine.high %v478_v18, %v478_v18  ;;  %v491_v23 = vsel %vm132_vm0, %v478_v18, 0  ;;  %v497_v44 = vsel %vm132_vm0, %v485_v40, 0  ;;  %v1369_v48 = vld [vmem:[#allocation5 + $0x90] ss:$12 sps:$4 sm:$0xff]   ;;  %v1381_v50 = vld [vmem:[#allocation5 + $0x180] ss:$12 sps:$4 sm:$0xff]  }
  0x68   :  { %1211 = vmatprep.subr.msk.bf16.mxu1 %vm132_vm0, %v126_v13  ;;  %v1372_v51 = vld [vmem:[#allocation5 + $0xa8] ss:$12 sps:$4 sm:$0xff]   ;;  %v1377_v52 = vld [vmem:[#allocation5 + $0xc4] ss:$12 sps:$4 sm:$0xff]   ;;  %v1375_v53 = vld [vmem:[#allocation5 + $0xc0] ss:$12 sps:$4 sm:$0xff]  }
  0x69   :  { %146 = vmatpush1.bf16.msra.mxu1 %v134_v14  ;;  %1221 = vmatprep.subr.msk.bf16.mxu0 %vm132_vm0, %v486_v21  ;;  %v1380_v54 = vld [vmem:[#allocation5 + $0xdc] ss:$12 sps:$4 sm:$0xff]   ;;  %v1378_v55 = vld [vmem:[#allocation5 + $0xd8] ss:$12 sps:$4 sm:$0xff]   ;;  %v1386_v56 = vld [vmem:[#allocation5 + $0xf4] ss:$12 sps:$4 sm:$0xff]  }
  0x6a   :  { %1213 = vmatprep.subr.msk.bf16.mxu1 %vm132_vm0, %v127_v17  ;;  %500 = vmatpush1.bf16.msra.mxu0 %v491_v23  ;;  %v1389_v57 = vld [vmem:[#allocation5 + $0x19c] ss:$12 sps:$4 sm:$0xff]   ;;  %v1387_v59 = vld [vmem:[#allocation5 + $0x198] ss:$12 sps:$4 sm:$0xff]   ;;  %v1395_v63 = vld [vmem:[#allocation5 + $0x1b4] ss:$12 sps:$4 sm:$0xff]  }
  0x6b   :  { %983 = vmatprep.subr.bf16.mxu0 %v1353_v24  ;;  %v1384_v58 = vld [vmem:[#allocation5 + $0xf0] ss:$12 sps:$4 sm:$0xff]   ;;  %v1390_v60 = vld [vmem:[#allocation5 + $0x108] ss:$12 sps:$4 sm:$0xff]   ;;  %v1392_v61 = vld [vmem:[#allocation5 + $0x10c] ss:$12 sps:$4 sm:$0xff]  }
  0x6c   :  { %1212 = vmatmul.mubr.msk.bf16.vlgmr.msra.gmra.mrb[0].mxu1 %vm128_vm1, %v108_v16  ;;  %v1393_v62 = vld [vmem:[#allocation5 + $0x1b0] ss:$12 sps:$4 sm:$0xff]   ;;  %v1401_v1 = vld [vmem:[#allocation5 + $0x1cc] ss:$12 sps:$4 sm:$0xff]   ;;  %v1399_v3 = vld [vmem:[#allocation5 + $0x1c8] ss:$12 sps:$4 sm:$0xff]  }
  0x6d   :  { %187 = vmatpush1.bf16.msra.mxu1 %v140_v20  ;;  %218 = vmatprep.mubr.bf16.mxu1 %v1575_v4  ;;  %v1398_v0 = vld [vmem:[#allocation5 + $0x124] ss:$12 sps:$4 sm:$0xff]   ;;  %v1396_v2 = vld [vmem:[#allocation5 + $0x120] ss:$12 sps:$4 sm:$0xff]   ;;  %v1404_v7 = vld [vmem:[#allocation5 + $0x13c] ss:$12 sps:$4 sm:$0xff]  }
  0x6e   :  { %251 = vmatprep.subr.bf16.mxu1 %v1346_v19  ;;  %1222 = vmatmul.mubr.msk.bf16.vlgmr.msra.gmra.mrb[0].mxu0 %vm128_vm1, %v468_v25  ;;  %v1402_v6 = vld [vmem:[#allocation5 + $0x138] ss:$12 sps:$4 sm:$0xff]   ;;  %v1405_v8 = vld [vmem:[#allocation5 + $0x1e0] ss:$12 sps:$4 sm:$0xff]   ;;  %v1408_v11 = vld [vmem:[#allocation5 + $0x150] ss:$12 sps:$4 sm:$0xff]  }
  0x6f   :  { %984 = vmatpush1.bf16.msra.mxu0 %v1351_v26  ;;  %v1407_v9 = vld [vmem:[#allocation5 + $0x1e4] ss:$12 sps:$4 sm:$0xff]   ;;  %v1410_v10 = vld [vmem:[#allocation5 + $0x154] ss:$12 sps:$4 sm:$0xff]   ;;  %v1413_v13 = vld [vmem:[#allocation5 + $0x1fc] ss:$12 sps:$4 sm:$0xff]  }
  0x70   :  { %985 = vmatprep.subr.bf16.mxu0 %v1356_v27  ;;  %v1411_v12 = vld [vmem:[#allocation5 + $0x1f8] ss:$12 sps:$4 sm:$0xff]   ;;  %v1419_v15 = vld [vmem:[#allocation5 + $0x214] ss:$12 sps:$4 sm:$0xff]   ;;  %v1417_v17 = vld [vmem:[#allocation5 + $0x210] ss:$12 sps:$4 sm:$0xff]  }
  0x71   :  { %v1416_v14 = vld [vmem:[#allocation5 + $0x16c] ss:$12 sps:$4 sm:$0xff]   ;;  %v1420_v19 = vld [vmem:[#allocation5 + $0x228] ss:$12 sps:$4 sm:$0xff]   ;;  %v1426_v20 = vld [vmem:[#allocation5 + $0x244] ss:$12 sps:$4 sm:$0xff]  }
  0x72   :  { %v1422_v18 = vld [vmem:[#allocation5 + $0x22c] ss:$12 sps:$4 sm:$0xff]   ;;  %v1428_v22 = vld [vmem:[#allocation5 + $0xc8] ss:$12 sps:$4 sm:$0xff]  }
  0x73   :  { %986 = vmatpush1.bf16.msra.mxu0 %v1354_v30  ;;  %v1424_v21 = vld [vmem:[#allocation5 + $0x240] ss:$12 sps:$4 sm:$0xff]   ;;  %v333_v36 = vld [vmem:[%s1797_s5] sm:$0xf] }
  0x74   :  { %1214 = vmatmul.mubr.msk.bf16.vlgmr.msra.gmra.mrb[4].mxu1 %vm128_vm1, %v108_v16  ;;  %987 = vmatprep.subr.bf16.mxu0 %v1359_v31  ;;  %v1414_v16 = vld [vmem:[#allocation5 + $0x168] ss:$12 sps:$4 sm:$0xff]  }
  0x75   :  { %252 = vmatpush1.bf16.msra.mxu1 %v1344_v28  ;;  %283 = vmatprep.mubr.bf16.mxu1 %v1575_v4 }
  0x76   :  { %292 = vmatprep.subr.bf16.mxu1 %v1349_v29 }
  0x77   :  { %988 = vmatpush1.bf16.msra.mxu0 %v1357_v33 }
  0x78   :  { %989 = vmatprep.subr.bf16.mxu0 %v1362_v34 }
  0x7b   :  { %990 = vmatpush1.bf16.msra.mxu0 %v1360_v38 }
  0x7c   :  { %1219 = vmatmul.mubr.msk.bf16.vlgmr.msra.gmra.mrb[8].mxu1 %vm247_vm2, %v102_v37  ;;  %991 = vmatprep.subr.bf16.mxu0 %v1365_v39 }
  0x7d   :  { %293 = vmatpush1.bf16.msra.mxu1 %v1347_v35  ;;  %324 = vmatprep.mubr.bf16.mxu1 %v1575_v4  ;;  %v1749_v35 = vsub.s32 0, %v1703_v5 }
  0x7e   :  { %1326 = vmatprep.subr.bf16.mxu1 %v1576_v43 }
  0x7f   :  { %992 = vmatpush1.bf16.msra.mxu0 %v1363_v41  ;;  %v338_v38 = vrot.slane %v333_v36, %v1749_v35 }
  0x80   :  { %993 = vmatprep.subr.bf16.mxu0 %v1368_v42 }
  0x83   :  { %994 = vmatpush1.bf16.msra.mxu0 %v1366_v45 }
  0x84   :  { %1220 = vmatmul.mubr.msk.bf16.vlgmr.msra.gmra.mrb[12].mxu1 %vm247_vm2, %v102_v37  ;;  %995 = vmatprep.subr.bf16.mxu0 %v1371_v47  ;;  %v1755_v37 = vsub.s32 1, %v1703_v5  ;;  %v1760_v47 = vsub.s32 2, %v1703_v5 }
  0x85   :  { %1327 = vmatpush3.bf16.msra.mxu1 %v497_v44  ;;  %1328 = vmatprep.mubr.msk.bf16.mxu1 %vm1577_vm3, %v1576_v43 }
  0x86   :  { %1024 = vmatprep.subr.bf16.mxu1 %v1383_v46  ;;  %v342_v40 = vrot.slane %v333_v36, %v1755_v37 }
  0x87   :  { %996 = vmatpush1.bf16.msra.mxu0 %v1369_v48 }
  0x88   :  { %997 = vmatprep.subr.bf16.mxu0 %v1374_v49  ;;  %v349_v49 = vsub.s32 3, %v1703_v5 }
  0x8b   :  { %998 = vmatpush1.bf16.msra.mxu0 %v1372_v51 }
  0x8c   :  { %1329 = vmatmul.mubr.msk.bf16.vlgmr.msra.gmra.mrb[16].mxu1 %vm128_vm1, %v468_v25  ;;  %999 = vmatprep.subr.bf16.mxu0 %v1377_v52  ;;  %v346_v52 = vrot.slane %v333_v36, %v1760_v47 }
  0x8d   :  { %1025 = vmatpush1.bf16.msra.mxu1 %v1381_v50 }
  0x8e   :  { %1026 = vmatprep.subr.bf16.mxu1 %v1389_v57 }
  0x8f   :  { %1000 = vmatpush1.bf16.msra.mxu0 %v1375_v53 }
  0x90   :  { %1001 = vmatprep.subr.bf16.mxu0 %v1380_v54 }
  0x91   :  { %1027 = vmatpush1.bf16.msra.mxu1 %v1387_v59 }
  0x92   :  { %1028 = vmatprep.subr.bf16.mxu1 %v1395_v63 }
  0x93   :  { %1002 = vmatpush1.bf16.msra.mxu0 %v1378_v55  ;;  %v350_v55 = vrot.slane %v333_v36, %v349_v49 }
  0x94   :  { %1003 = vmatprep.subr.bf16.mxu0 %v1386_v56  ;;  %v1423_v56 = vld [vmem:[#allocation5 + $0x188] ss:$12 sps:$4 sm:$0xff]  }
  0x95   :  { %1029 = vmatpush1.bf16.msra.mxu1 %v1393_v62 }
  0x96   :  { %1030 = vmatprep.subr.bf16.mxu1 %v1401_v1 }
  0x97   :  { %1004 = vmatpush1.bf16.msra.mxu0 %v1384_v58 }
  0x98   :  { %1005 = vmatprep.subr.bf16.mxu0 %v1392_v61 }
  0x99   :  { %1031 = vmatpush1.bf16.msra.mxu1 %v1399_v3 }
  0x9a   :  { %1032 = vmatprep.subr.bf16.mxu1 %v1407_v9 }
  0x9b   :  { %1006 = vmatpush1.bf16.msra.mxu0 %v1390_v60 }
  0x9c   :  { %1007 = vmatprep.subr.bf16.mxu0 %v1398_v0  ;;  %v1427_v0 = vld [vmem:[#allocation5 + $0x1a0] ss:$12 sps:$4 sm:$0xff]  }
  0x9d   :  { %1033 = vmatpush1.bf16.msra.mxu1 %v1405_v8 }
  0x9e   :  { %1034 = vmatprep.subr.bf16.mxu1 %v1413_v13 }
  0x9f   :  { %1008 = vmatpush1.bf16.msra.mxu0 %v1396_v2 }
  0xa0   :  { %1009 = vmatprep.subr.bf16.mxu0 %v1404_v7  ;;  %v1430_v7 = vld [vmem:[#allocation5 + $0x1b8] ss:$12 sps:$4 sm:$0xff]  }
  0xa1   :  { %1035 = vmatpush1.bf16.msra.mxu1 %v1411_v12 }
  0xa2   :  { %1036 = vmatprep.subr.bf16.mxu1 %v1419_v15  ;;  %v1433_v15 = vld [vmem:[#allocation5 + $0x1d0] ss:$12 sps:$4 sm:$0xff]  }
  0xa3   :  { %1010 = vmatpush1.bf16.msra.mxu0 %v1402_v6  ;;  %v1429_v6 = vld [vmem:[#allocation5 + $0x8] ss:$12 sps:$4 sm:$0xff]  }
  0xa4   :  { %1011 = vmatprep.subr.bf16.mxu0 %v1410_v10  ;;  %v1431_v10 = vld [vmem:[#allocation5 + $0xe0] ss:$12 sps:$4 sm:$0xff]  }
  0xa5   :  { %1037 = vmatpush1.bf16.msra.mxu1 %v1417_v17  ;;  %v1435_v17 = vld [vmem:[#allocation5 + $0x38] ss:$12 sps:$4 sm:$0xff]  }
  0xa6   :  { %1038 = vmatprep.subr.bf16.mxu1 %v1422_v18  ;;  %v1436_v18 = vld [vmem:[#allocation5 + $0x1e8] ss:$12 sps:$4 sm:$0xff]  }
  0xa7   :  { %1012 = vmatpush1.bf16.msra.mxu0 %v1408_v11 }
  0xa8   :  { %1013 = vmatprep.subr.bf16.mxu0 %v1416_v14  ;;  %v1432_v14 = vld [vmem:[#allocation5 + $0x20] ss:$12 sps:$4 sm:$0xff]  }
  0xa9   :  { %1039 = vmatpush1.bf16.msra.mxu1 %v1420_v19  ;;  %v1437_v19 = vld [vmem:[#allocation5 + $0x110] ss:$12 sps:$4 sm:$0xff]  }
  0xaa   :  { %1040 = vmatprep.subr.bf16.mxu1 %v1426_v20  ;;  %v1438_v20 = vld [vmem:[#allocation5 + $0x50] ss:$12 sps:$4 sm:$0xff]  }
  0xab   :  { %1014 = vmatpush1.bf16.msra.mxu0 %v1414_v16  ;;  %v1434_v16 = vld [vmem:[#allocation5 + $0xf8] ss:$12 sps:$4 sm:$0xff]  }
  0xac   :  { %1105 = vmatprep.subr.bf16.mxu0 %v1575_v4 }
  0xad   :  { %1041 = vmatpush1.bf16.msra.mxu1 %v1424_v21  ;;  %v1439_v21 = vld [vmem:[#allocation5 + $0x200] ss:$12 sps:$4 sm:$0xff]  }
  0xae   :  { %1304 = vmatprep.subr.bf16.mxu1 %v1428_v22  ;;  %v1440_v22 = vld [vmem:[#allocation5 + $0x128] ss:$12 sps:$4 sm:$0xff]  }
 0x13f   :  { %v179_v23 = vpop.f32.mrb[0].mxu1 }
 0x140   :  { %v181_v24 = vpop.f32.mrb[1].mxu1 }
 0x141   :  { %v183_v25 = vpop.f32.mrb[2].mxu1  ;;  %v1744_v27 = vpop.f32.mrb[0].mxu0 }
 0x142   :  { %v184_v26 = vpop.f32.mrb[3].mxu1  ;;  %v1746_v28 = vpop.f32.mrb[1].mxu0  ;;  %v1443_v25 = vld [vmem:[#allocation5 + $0x140] ss:$12 sps:$4 sm:$0xff]  }
 0x143   :  { %v537_v29 = vpop.f32.mrb[2].mxu0  ;;  %v1444_v26 = vld [vmem:[#allocation5 + $0x80] ss:$12 sps:$4 sm:$0xff]  }
 0x144   :  { %v538_v31 = vpop.f32.mrb[3].mxu0  ;;  %v1445_v29 = vld [vmem:[#allocation5 + $0x230] ss:$12 sps:$4 sm:$0xff]  }
 0x145   :  { %v1447_v31 = vld [vmem:[#allocation5 + $0x98] ss:$12 sps:$4 sm:$0xff]  }
 0x147   :  { %v220_v30 = vpop.f32.mrb[4].mxu1 }
 0x148   :  { %v222_v32 = vpop.f32.mrb[5].mxu1 }
 0x149   :  { %v224_v33 = vpop.f32.mrb[6].mxu1 }
 0x14a   :  { %v225_v34 = vpop.f32.mrb[7].mxu1  ;;  %v1449_v33 = vld [vmem:[#allocation5 + $0x170] ss:$12 sps:$4 sm:$0xff]  }
 0x14b   :  { %v1450_v34 = vld [vmem:[#allocation5 + $0xb0] ss:$12 sps:$4 sm:$0xff]  }
 0x14f   :  { %v285_v39 = vpop.f32.mrb[8].mxu1 }
 0x150   :  { %v286_v41 = vadd.f32 %v285_v39, %v179_v23  ;;  %v287_v42 = vpop.f32.mrb[9].mxu1  ;;  %v1441_v23 = vld [vmem:[#allocation5 + $0x68] ss:$12 sps:$4 sm:$0xff]  }
 0x151   :  { %v288_v43 = vadd.f32 %v287_v42, %v181_v24  ;;  %v289_v44 = vpop.f32.mrb[10].mxu1  ;;  %v1442_v24 = vld [vmem:[#allocation5 + $0x218] ss:$12 sps:$4 sm:$0xff]  }
 0x152   :  { %v355_v45 = vadd.f32 %v338_v38, %v286_v41  ;;  %v290_v46 = vpop.f32.mrb[11].mxu1 }
 0x153   :  { %v356_v48 = vadd.f32 %v342_v40, %v288_v43  ;;  %v1145_v43 = vld [vmem:[#allocation8] sm:$0x7]  ;;  %v1168_v46 = vld [vmem:[#allocation10] sm:$0x7] }
 0x154   :  { %v359_v50 = vmax.f32 %v355_v45, 0.0  ;;  %v1154_v45 = vrot.slane %v1145_v43, %v1755_v37 }
 0x155   :  { %v360_v51 = vmax.f32 %v356_v48, 0.0 }
 0x156   :  { %v1764_v57 = vpack.c.bf16 %v359_v50, %v359_v50 }
 0x157   :  { %v364_v53 = vpack.c.bf16 %v360_v51, %v360_v51  ;;  %v326_v54 = vpop.f32.mrb[12].mxu1 }
 0x158   :  { %v327_v58 = vadd.f32 %v326_v54, %v220_v30  ;;  %v328_v59 = vpop.f32.mrb[13].mxu1  ;;  %v1446_v30 = vld [vmem:[#allocation5 + $0x158] ss:$12 sps:$4 sm:$0xff]  }
 0x159   :  { %v329_v60 = vadd.f32 %v328_v59, %v222_v32  ;;  %v330_v61 = vpop.f32.mrb[14].mxu1  ;;  %1015 = vmatprep.mubr.bf16.mxu0 %v364_v53  ;;  %v1448_v32 = vld [vmem:[#allocation5 + $0x248] ss:$12 sps:$4 sm:$0xff]  }
 0x15a   :  { %v357_v62 = vadd.f32 %v346_v52, %v327_v58  ;;  %v331_v63 = vpop.f32.mrb[15].mxu1  ;;  %1016 = vmatmul.mubr.bf16.vlgmr.msra.gmra.mrb[4].mxu0 %v1764_v57 }
 0x15b   :  { %v358_v5 = vadd.f32 %v350_v55, %v329_v60  ;;  %1106 = vmatpush1.bf16.msra.mxu0 %v1423_v56 }
 0x15c   :  { %v361_v1 = vmax.f32 %v357_v62, 0.0  ;;  %1107 = vmatprep.subr.bf16.mxu0 %v1575_v4 }
 0x15d   :  { %v362_v2 = vmax.f32 %v358_v5, 0.0 }
 0x15e   :  { %v365_v9 = vpack.c.bf16 %v361_v1, %v361_v1 }
 0x15f   :  { %v366_v3 = vpack.c.bf16 %v362_v2, %v362_v2  ;;  %1108 = vmatpush1.bf16.msra.mxu0 %v1427_v0  ;;  %v1768_v8 = vpop.f32.mrb[16].mxu1 }
 0x160   :  { %1109 = vmatprep.subr.bf16.mxu0 %v1575_v4  ;;  %v1330_v11 = vpop.f32.mrb[17].mxu1 }
 0x161   :  { %1299 = vmatprep.mubr.msk.bf16.mxu1 %vm247_vm2, %v366_v3  ;;  %1300 = vmatprep.mubr.msk.bf16.mxu0 %vm247_vm2, %v366_v3  ;;  %v577_v12 = vpop.f32.mrb[18].mxu1 }
 0x162   :  { %1057 = vmatmul.mubr.bf16.vlgmr.msra.gmra.mrb[20].mxu1 %v365_v9  ;;  %v1331_v13 = vpop.f32.mrb[19].mxu1 }
 0x163   :  { %1305 = vmatpush3.bf16.msra.mxu1 %v1429_v6  ;;  %1110 = vmatpush1.bf16.msra.mxu0 %v1430_v7 }
 0x164   :  { %1097 = vmatprep.mubr.bf16.mxu1 %v364_v53  ;;  %1306 = vmatprep.subr.bf16.mxu1 %v1431_v10 }
 0x165   :  { %1111 = vmatprep.subr.bf16.mxu0 %v1575_v4 }
 0x167   :  { %1307 = vmatpush3.bf16.msra.mxu1 %v1432_v14  ;;  %1112 = vmatpush1.bf16.msra.mxu0 %v1433_v15  ;;  %v1301_v14 = vld [vmem:[#allocation2] ss:$0 sm:$0xff] }
 0x168   :  { %1308 = vmatprep.subr.bf16.mxu1 %v1434_v16  ;;  %1113 = vmatprep.subr.bf16.mxu0 %v1575_v4 }
 0x16b   :  { %1309 = vmatpush3.bf16.msra.mxu1 %v1435_v17  ;;  %1114 = vmatpush1.bf16.msra.mxu0 %v1436_v18 }
 0x16c   :  { %1310 = vmatprep.subr.bf16.mxu1 %v1437_v19  ;;  %1115 = vmatprep.subr.bf16.mxu0 %v1575_v4 }
 0x16f   :  { %1311 = vmatpush3.bf16.msra.mxu1 %v1438_v20  ;;  %1116 = vmatpush1.bf16.msra.mxu0 %v1439_v21 }
 0x170   :  { %1312 = vmatprep.subr.bf16.mxu1 %v1440_v22  ;;  %1117 = vmatprep.subr.bf16.mxu0 %v1575_v4 }
 0x173   :  { %1313 = vmatpush3.bf16.msra.mxu1 %v1441_v23  ;;  %1118 = vmatpush1.bf16.msra.mxu0 %v1442_v24 }
 0x174   :  { %1314 = vmatprep.subr.bf16.mxu1 %v1443_v25  ;;  %1119 = vmatprep.subr.bf16.mxu0 %v1575_v4 }
 0x177   :  { %1315 = vmatpush3.bf16.msra.mxu1 %v1444_v26  ;;  %1120 = vmatpush1.bf16.msra.mxu0 %v1445_v29 }
 0x178   :  { %1316 = vmatprep.subr.bf16.mxu1 %v1446_v30  ;;  %1121 = vmatprep.subr.bf16.mxu0 %v1575_v4  ;;  %v1150_v4 = vrot.slane %v1145_v43, %v1749_v35 }
 0x17b   :  { %1317 = vmatpush3.bf16.msra.mxu1 %v1447_v31  ;;  %1122 = vmatpush1.bf16.msra.mxu0 %v1448_v32 }
 0x17c   :  { %1318 = vmatprep.subr.bf16.mxu1 %v1449_v33 }
 0x17e   :  { %1138 = vmatmul.mubr.bf16.vlgmr.msra.gmra.mrb[8].mxu0 %v365_v9  ;;  %v1181_v9 = vrot.slane %v1168_v46, %v1760_v47 }
 0x17f   :  { %1319 = vmatpush3.bf16.msra.mxu1 %v1450_v34 }
 0x182   :  { %1098 = vmatmul.mubr.bf16.vlgmr.msra.gmra.mrb[24].mxu1 %v1764_v57 }
 0x22d   :  { %v1017_v36 = vpop.f32.mrb[4].mxu0 }
 0x22e   :  { %v1018_v38 = vadd.f32 %v1017_v36, %v1744_v27  ;;  %v1019_v39 = vpop.f32.mrb[5].mxu0  ;;  %v1173_v27 = vrot.slane %v1168_v46, %v1749_v35  ;;  %v1158_v35 = vrot.slane %v1145_v43, %v1760_v47 }
 0x22f   :  { %v1020_v40 = vadd.f32 %v1019_v39, %v1746_v28  ;;  %v1021_v41 = vpop.f32.mrb[6].mxu0  ;;  %v1177_v28 = vrot.slane %v1168_v46, %v1755_v37 }
 0x230   :  { %v1022_v42 = vpop.f32.mrb[7].mxu0 }
 0x235   :  { %v1058_v44 = vpop.f32.mrb[20].mxu1 }
 0x236   :  { %v1059_v48 = vadd.f32 %v1058_v44, %v1018_v38  ;;  %v1060_v49 = vpop.f32.mrb[21].mxu1 }
 0x237   :  { %v1061_v50 = vadd.f32 %v1060_v49, %v1020_v40  ;;  %v1062_v51 = vpop.f32.mrb[22].mxu1 }
 0x238   :  { %v1162_v52 = vadd.f32 %v1150_v4, %v1059_v48  ;;  %v1063_v53 = vpop.f32.mrb[23].mxu1 }
 0x239   :  { %v1163_v54 = vadd.f32 %v1154_v45, %v1061_v50 }
 0x23a   :  { %v1165_v55 = vmax.f32 %v1162_v52, 0.0 }
 0x23b   :  { %v1166_v56 = vmax.f32 %v1163_v54, 0.0 }
 0x23c   :  { %v1185_v57 = vmul.f32 %v1173_v27, %v1165_v55 }
 0x23d   :  { %v1186_v58 = vmul.f32 %v1177_v28, %v1166_v56 }
 0x23f   :  { %v1188_v59 = vadd.f32 %v1186_v58, %v1185_v57 }
 0x251   :  { %v1139_v60 = vpop.f32.mrb[8].mxu0 }
 0x252   :  { %v1141_v61 = vpop.f32.mrb[9].mxu0 }
 0x253   :  { %v1142_v62 = vpop.f32.mrb[10].mxu0 }
 0x254   :  { %v1143_v63 = vpop.f32.mrb[11].mxu0 }
 0x255   :  { %v1320_v5 = vpop.f32.mrb[24].mxu1 }
 0x256   :  { %v1321_v0 = vpop.f32.mrb[25].mxu1 }
 0x257   :  { %v1322_v1 = vadd.f32 %v1321_v0, %v1320_v5  ;;  %v1323_v2 = vpop.f32.mrb[26].mxu1 }
 0x258   :  { %v1324_v3 = vpop.f32.mrb[27].mxu1 }
 0x259   :  { %v1100_v6 = vadd.f32 %v1322_v1, %v1768_v8 }
 0x25b   :  { %v1140_v7 = vadd.f32 %v1139_v60, %v1100_v6 }
 0x25d   :  { %v1164_v37 = vadd.f32 %v1158_v35, %v1140_v7 }
 0x25f   :  { %v1167_v10 = vmax.f32 %v1164_v37, 0.0 }
 0x261   :  { %v1187_v11 = vmul.f32 %v1181_v9, %v1167_v10 }
 0x263   :  { %v1190_v12 = vsel %vm1189_vm4, %v1187_v11, 0.0 }
 0x264   :  { %v1191_v13 = vadd.f32 %v1190_v12, %v1188_v59 }
 0x266   :  { %1192 = vadd.xlane.f32.xlu0 %v1191_v13 }
 0x2f3   :  { %v1193_v15 = vpop.xlane.xlu0 %1192 }
 0x2f4   :  { %v1201_v16 = vadd.f32 %v1301_v14, %v1193_v15 }
 0x2f6   :  { %1203 = vst.msk [vmem:[%s1803_s11] sm:$0xff] %vm1202_vm5, %v1201_v16 }
 0x2f7   :  { %1208 = vsyncpa [#allocation4], 1 }
 0x2f8   :  { %1209 = vsyncpa [#allocation6], 1 }
 0x2f9   :  { %1210 = vsyncpa [#allocation9], 1 }

</bundles_post_ra>
